<compile_context>
chip_gen: v7x
topology: tpu7x:2x2x1
jax: 0.10.0
libtpu: 0.0.40
codegen_flags: <defaults>
</compile_context>

<pallas_src>
import math
import functools

import jax
import jax.numpy as jnp
from jax import lax
from jax.experimental import pallas as pl
from jax.experimental.pallas import tpu as pltpu

EPS = 1e-12  # HF ViTConfig layer_norm_eps


# ----------------------------- in-kernel helpers -----------------------------

def _layernorm(x, g, b):
    x = x.astype(jnp.float32)
    mu = jnp.mean(x, axis=-1, keepdims=True)
    var = jnp.mean((x - mu) ** 2, axis=-1, keepdims=True)
    return (x - mu) * lax.rsqrt(var + EPS) * g + b


def _gelu(x):
    # exact (erf-based) GELU, as used by HF ViT ("gelu")
    return 0.5 * x * (1.0 + lax.erf(x * (1.0 / math.sqrt(2.0))))


def _mm(a, w):
    # a: f32 activation, w: bf16 weight -> bf16 MXU issue, f32 accumulate.
    return jnp.dot(a.astype(jnp.bfloat16), w, preferred_element_type=jnp.float32)


# --------------------------------- kernels -----------------------------------

def patch_embed_kernel(p_ref, w_ref, b_ref, o_ref):
    # p: (TM, C*P*P) f32, w: (C*P*P, H) bf16, b: (1, H) f32 -> o: (TM, H) f32
    o_ref[...] = _mm(p_ref[...], w_ref[...]) + b_ref[...]


def encoder_layer_kernel(x_ref,
                         ln1_g_ref, ln1_b_ref,
                         wq_ref, bq_ref, wk_ref, bk_ref, wv_ref, bv_ref,
                         wo3_ref, bo_ref,
                         ln2_g_ref, ln2_b_ref,
                         wi_ref, bi_ref, wout_ref, bout_ref,
                         wd_ref, bd_ref, wu_ref, bu_ref,
                         lnf_g_ref, lnf_b_ref,
                         o_ref, *, num_heads, apply_final_ln):
    # one grid step == one batch element; x block is (1, S, H)
    x = x_ref[0]                                   # (S, H) f32 residual stream
    S, H = x.shape
    hd = H // num_heads
    scale = 1.0 / math.sqrt(hd)

    # ---- self-attention (pre-LN, HF ViTLayer ordering) ----
    hn = _layernorm(x, ln1_g_ref[...], ln1_b_ref[...])
    # lane-dense (N == H) QKV projections
    q = _mm(hn, wq_ref[...]) + bq_ref[...]
    k = _mm(hn, wk_ref[...]) + bk_ref[...]
    v = _mm(hn, wv_ref[...]) + bv_ref[...]
    q = q * scale                                  # fold 1/sqrt(hd) into q

    qb = q.astype(jnp.bfloat16)
    kb = k.astype(jnp.bfloat16)
    vb = v.astype(jnp.bfloat16)

    def split_heads(t):                            # (S, H) -> (NH, S, hd)
        return jnp.stack([t[:, h * hd:(h + 1) * hd] for h in range(num_heads)],
                         axis=0)

    q3, k3, v3 = split_heads(qb), split_heads(kb), split_heads(vb)

    # batched multi-head attention; softmax math in f32
    s = jnp.einsum('nqd,nkd->nqk', q3, k3, preferred_element_type=jnp.float32)
    s = s - jnp.max(s, axis=-1, keepdims=True)
    p = jnp.exp(s)
    p = p * pl.reciprocal(jnp.sum(p, axis=-1, keepdims=True), approx=True)
    ctx = jnp.einsum('nqk,nkd->nqd', p.astype(jnp.bfloat16), v3,
                     preferred_element_type=jnp.float32)           # (NH, S, hd)

    # per-head output projection, summed over heads (no lane-axis concat)
    attn = jnp.einsum('nqd,ndh->nqh', ctx.astype(jnp.bfloat16), wo3_ref[...],
                      preferred_element_type=jnp.float32)          # (NH, S, H)
    x1 = x + jnp.sum(attn, axis=0) + bo_ref[...]

    # ---- MLP (pre-LN on the residual stream) ----
    hn2 = _layernorm(x1, ln2_g_ref[...], ln2_b_ref[...])
    inter = _gelu(_mm(hn2, wi_ref[...]) + bi_ref[...])
    x2 = x1 + _mm(inter, wout_ref[...]) + bout_ref[...]

    # ---- Adapter: x + up(relu(down(x))) ----
    down = jnp.maximum(_mm(x2, wd_ref[...]) + bd_ref[...], 0.0)
    y = x2 + _mm(down, wu_ref[...]) + bu_ref[...]

    # ---- fused final model.layernorm (last layer only; static flag) ----
    if apply_final_ln:
        y = _layernorm(y, lnf_g_ref[...], lnf_b_ref[...])
    o_ref[0] = y


# ------------------------------ pallas wrappers -------------------------------

def _full_spec(shape):
    nd = len(shape)
    return pl.BlockSpec(shape, lambda b: (0,) * nd)


def patch_embed_matmul(x, w, b, tm=256):
    # Row-tiled matmul: grid over M = B*Np rows, parallel (pipelines HBM loads,
    # lets both v7x TensorCores split the rows).
    M, K = x.shape
    N = w.shape[1]
    tm = min(tm, M)
    return pl.pallas_call(
        patch_embed_kernel,
        out_shape=jax.ShapeDtypeStruct((M, N), jnp.float32),
        grid=(pl.cdiv(M, tm),),
        in_specs=[pl.BlockSpec((tm, K), lambda i: (i, 0)),
                  pl.BlockSpec((K, N), lambda i: (0, 0)),
                  pl.BlockSpec((1, N), lambda i: (0, 0))],
        out_specs=pl.BlockSpec((tm, N), lambda i: (i, 0)),
        compiler_params=pltpu.CompilerParams(dimension_semantics=("parallel",)),
    )(x, w, b)


LAYER_KEYS = ["ln1_g", "ln1_b", "wq", "bq", "wk", "bk", "wv", "bv",
              "wo3", "bo", "ln2_g", "ln2_b", "wi", "bi", "wout", "bout",
              "wd", "bd", "wu", "bu"]


def encoder_layer(x, layer_params, lnf_g, lnf_b, num_heads, apply_final_ln):
    B, S, H = x.shape
    params = [layer_params[k] for k in LAYER_KEYS] + [lnf_g, lnf_b]
    return pl.pallas_call(
        functools.partial(encoder_layer_kernel, num_heads=num_heads,
                          apply_final_ln=apply_final_ln),
        out_shape=jax.ShapeDtypeStruct((B, S, H), jnp.float32),
        grid=(B,),
        in_specs=[pl.BlockSpec((1, S, H), lambda b: (b, 0, 0))]
                 + [_full_spec(p.shape) for p in params],
        out_specs=pl.BlockSpec((1, S, H), lambda b: (b, 0, 0)),
        compiler_params=pltpu.CompilerParams(
            dimension_semantics=("parallel",),
            # headroom for real-size bf16 layer weights (double-buffered) +
            # activations; safely below physical VMEM on v5e/v6e/v7x.
            vmem_limit_bytes=48 * 1024 * 1024),
    )(x, *params)


# ------------------------------ glue (plain JAX) -------------------------------

def extract_patches(x, P):
    # NCHW -> (B, num_patches, C*P*P), flattened in (C, P, P) order to match the
    # flattened Conv2d(kernel=stride=P) weight.
    B, C, Himg, Wimg = x.shape
    Hp, Wp = Himg // P, Wimg // P
    x = x.reshape(B, C, Hp, P, Wp, P)
    x = x.transpose(0, 2, 4, 1, 3, 5)              # (B, Hp, Wp, C, P, P)
    return x.reshape(B, Hp * Wp, C * P * P)


def vit_encoder_forward(x, params, cfg):
    B = x.shape[0]
    P, H, NH = cfg["patch"], cfg["hidden"], cfg["heads"]

    # --- embeddings: patch conv (as tiled matmul kernel) + CLS + position ---
    patches = extract_patches(x, P)                # (B, Np, C*P*P)
    Np = patches.shape[1]
    emb = patch_embed_matmul(patches.reshape(B * Np, -1),
                             params["patch_w"], params["patch_b"])
    emb = emb.reshape(B, Np, H)
    cls = jnp.broadcast_to(params["cls"], (B, 1, H))
    seq = jnp.concatenate([cls, emb], axis=1) + params["pos"]   # (B, 1+Np, H)

    # --- encoder layers + adapters; final LN fused into the last layer ---
    L = len(params["layers"])
    for li, lp in enumerate(params["layers"]):
        seq = encoder_layer(seq, lp, params["ln_g"], params["ln_b"], NH,
                            apply_final_ln=(li == L - 1))
    return seq


# ------------------------------ param init -------------------------------------

def init_params(key, cfg):
    C, P, H, I, A, L, NH = (cfg["channels"], cfg["patch"], cfg["hidden"],
                            cfg["intermediate"], cfg["adapter"], cfg["layers"],
                            cfg["heads"])
    hd = H // NH
    S = 1 + (cfg["image"] // P) ** 2
    WD = jnp.bfloat16   # weight storage dtype (bf16 streaming + bf16 MXU issue)

    def nrm(k, shape, dtype=jnp.float32, scale=0.02):
        return (scale * jax.random.normal(k, shape)).astype(dtype)

    keys = jax.random.split(key, 4 + L)
    params = {
        "patch_w": nrm(keys[0], (C * P * P, H), WD),   # conv weight, (in, out)
        "patch_b": jnp.zeros((1, H), jnp.float32),
        "cls": nrm(keys[1], (1, 1, H)),
        "pos": nrm(keys[2], (1, S, H)),
        "ln_g": jnp.ones((1, H), jnp.float32),
        "ln_b": jnp.zeros((1, H), jnp.float32),
        "layers": [],
    }
    for li in range(L):
        lk = jax.random.split(keys[4 + li], 8)
        # wo in (in=NH*hd, out=H) layout, split per head -> (NH, hd, H)
        wo_dense = nrm(lk[3], (H, H))
        lp = {
            "ln1_g": jnp.ones((1, H), jnp.float32),
            "ln1_b": jnp.zeros((1, H), jnp.float32),
            "wq": nrm(lk[0], (H, H), WD), "bq": jnp.zeros((1, H), jnp.float32),
            "wk": nrm(lk[1], (H, H), WD), "bk": jnp.zeros((1, H), jnp.float32),
            "wv": nrm(lk[2], (H, H), WD), "bv": jnp.zeros((1, H), jnp.float32),
            "wo3": wo_dense.reshape(NH, hd, H).astype(WD),
            "bo": jnp.zeros((1, H), jnp.float32),
            "ln2_g": jnp.ones((1, H), jnp.float32),
            "ln2_b": jnp.zeros((1, H), jnp.float32),
            "wi": nrm(lk[4], (H, I), WD), "bi": jnp.zeros((1, I), jnp.float32),
            "wout": nrm(lk[5], (I, H), WD), "bout": jnp.zeros((1, H), jnp.float32),
            "wd": nrm(lk[6], (H, A), WD), "bd": jnp.zeros((1, A), jnp.float32),
            "wu": nrm(lk[7], (A, H), WD), "bu": jnp.zeros((1, H), jnp.float32),
        }
        params["layers"].append(lp)
    return params


# ---------------------------------- main ---------------------------------------

if __name__ == "__main__":
    # small ViT-like config (ViT-B/16 scaled down): hidden=32, 4 heads, mlp=4x,
    # 2 layers, patch=4 on a 16x16 RGB image -> seq = 1 + 16 = 17, adapter_dim=16.
    cfg = dict(channels=3, image=16, patch=4, hidden=32, heads=4,
               intermediate=64, layers=2, adapter=16)

    key = jax.random.PRNGKey(0)
    kx, kp = jax.random.split(key)
    x = jax.random.normal(kx, (2, cfg["channels"], cfg["image"], cfg["image"]),
                          dtype=jnp.float32)
    params = init_params(kp, cfg)

    out = vit_encoder_forward(x, params, cfg)
    out = jax.block_until_ready(out)
    assert out.shape == (2, 1 + (cfg["image"] // cfg["patch"]) ** 2, cfg["hidden"])
    assert bool(jnp.all(jnp.isfinite(out)))
    print("KERNEL_OK")
</pallas_src>

<mosaic_0001>
module attributes {stable_mosaic.version = 11 : i64} {
  func.func @patch_embed_kernel(%arg0: i32, %arg1: memref<32x48xf32, #tpu.memory_space<vmem>>, %arg2: memref<48x32xbf16, #tpu.memory_space<vmem>>, %arg3: memref<1x32xf32, #tpu.memory_space<vmem>>, %arg4: memref<32x32xf32, #tpu.memory_space<vmem>>) attributes {dimension_semantics = [#tpu.dimension_semantics<parallel>], iteration_bounds = array<i64: 1>, scalar_prefetch = 0 : i64, scratch_operands = 0 : i64, tpu.core_type = #tpu.core_type<tc>, window_params = [{transform_indices = @transform_0, window_bounds = array<i64: 32, 48>}, {pipeline_mode = #tpu.pipeline_mode<synchronous>, transform_indices = @transform_1, window_bounds = array<i64: 48, 32>}, {pipeline_mode = #tpu.pipeline_mode<synchronous>, transform_indices = @transform_2, window_bounds = array<i64: 1, 32>}, {transform_indices = @transform_3, window_bounds = array<i64: 32, 32>}]} {
    %c0 = arith.constant 0 : index
    %c0_0 = arith.constant 0 : index
    %0 = vector.load %arg1[%c0, %c0_0] : memref<32x48xf32, #tpu.memory_space<vmem>>, vector<32x48xf32>
    %c0_1 = arith.constant 0 : index
    %c0_2 = arith.constant 0 : index
    %1 = vector.load %arg2[%c0_1, %c0_2] : memref<48x32xbf16, #tpu.memory_space<vmem>>, vector<48x32xbf16>
    %2 = arith.truncf %0 : vector<32x48xf32> to vector<32x48xbf16>
    %cst = arith.constant dense<0.000000e+00> : vector<32x32xf32>
    %3 = tpu.matmul %2, %1, %cst {dimension_numbers = #tpu.dot_dimension_numbers<[1], [0], [0], [1], [0, 0, 1, 1], [], []>} : vector<32x48xbf16>, vector<48x32xbf16>, vector<32x32xf32> -> vector<32x32xf32>
    %c0_3 = arith.constant 0 : index
    %c0_4 = arith.constant 0 : index
    %4 = vector.load %arg3[%c0_3, %c0_4] : memref<1x32xf32, #tpu.memory_space<vmem>>, vector<1x32xf32>
    %5 = vector.broadcast %4 : vector<1x32xf32> to vector<32x32xf32>
    %6 = arith.addf %3, %5 : vector<32x32xf32>
    %c0_5 = arith.constant 0 : index
    %c0_6 = arith.constant 0 : index
    %7 = vector.load %arg4[%c0_5, %c0_6] : memref<32x32xf32, #tpu.memory_space<vmem>>, vector<32x32xf32>
    tpu.vector_store %arg4[%c0_5, %c0_6], %6 {strides = array<i32>} : memref<32x32xf32, #tpu.memory_space<vmem>>, vector<32x32xf32>,
    return
  }
  func.func @transform_0(%arg0: i32) -> (i32, i32) {
    %c0_i32 = arith.constant 0 : i32
    %c0_i32_0 = arith.constant 0 : i32
    return %arg0, %c0_i32 : i32, i32
  }
  func.func @transform_1(%arg0: i32) -> (i32, i32) {
    %c0_i32 = arith.constant 0 : i32
    %c0_i32_0 = arith.constant 0 : i32
    %c0_i32_1 = arith.constant 0 : i32
    return %c0_i32, %c0_i32_0 : i32, i32
  }
  func.func @transform_2(%arg0: i32) -> (i32, i32) {
    %c0_i32 = arith.constant 0 : i32
    %c0_i32_0 = arith.constant 0 : i32
    %c0_i32_1 = arith.constant 0 : i32
    return %c0_i32, %c0_i32_0 : i32, i32
  }
  func.func @transform_3(%arg0: i32) -> (i32, i32) {
    %c0_i32 = arith.constant 0 : i32
    %c0_i32_0 = arith.constant 0 : i32
    return %arg0, %c0_i32 : i32, i32
  }
}

</mosaic_0001>

<bundles_post_ra>
// kernel: tpu_custom_call.1
= control target key start
LH: loop header
LB: loop body
LE: loop exit
PB: predicated region body
PF: predicated region fallthrough
CT: control target
= control target key end

     0   :  { %vm53_vm0 = vcmask 392192   ;;  %s240_s0 = inlined_call_operand.vmem [shape: f32[32,48], index: 0, kind: input, shape index: {}]   ;;  %s241_s1 = inlined_call_operand.vmem [shape: bf16[48,32], index: 1, kind: input, shape index: {}]   ;;  %s242_s2 = inlined_call_operand.vmem [shape: f32[1,32], index: 2, kind: input, shape index: {}]   ;;  %s243_s3 = inlined_call_operand.hbm [shape: f32[32,32], index: 3, kind: output, shape index: {}]  }
   0x1   :  { %v154_v0 = vld [vmem:[%s241_s1] sm:$0xff]   ;;  %v155_v1 = vld [vmem:[%s241_s1 + $0x8] sm:$0xff]   ;;  %v156_v4 = vld [vmem:[%s241_s1 + $0x10] sm:$0xff]  }
   0x2   :  { %141 = vmatprep.subr.bf16.mxu0 %v154_v0  ;;  %v16_v2 = vld [vmem:[%s240_s0] sm:$0xff]  ;;  %v17_v3 = vld [vmem:[%s240_s0 + $0x8] sm:$0xff] }
   0x3   :  { %142 = vmatpush3.bf16.msra.mxu0 %v154_v0  ;;  %v26_v5 = vpack.c.bf16 %v17_v3, %v16_v2 }
   0x4   :  { %143 = vmatprep.subr.bf16.mxu0 %v155_v1 }
   0x5   :  { %8 = vsyncpa [#allocation3], 0  ;;  %147 = vmatprep.mubr.msk.bf16.mxu0 %vm53_vm0, %v26_v5  ;;  %v18_v6 = vld [vmem:[%s240_s0 + $0x10] sm:$0xff]  ;;  %v19_v7 = vld [vmem:[%s240_s0 + $0x18] sm:$0xff]  ;;  %vm109_vm1 = vcmask 261120   ;;  %s181_s1 = smov [#allocation2]  }
   0x6   :  { %v27_v8 = vpack.c.bf16 %v19_v7, %v18_v6  ;;  %v130_v9 = vld [vmem:[%s242_s2] ss:$0 sm:$0xff]  ;;  %s119_s28 = sshll.u32 %s181_s1, 4  ;;  %s120_s28 = int_to_ptr.vmem [resolvable:$true] %s119_s28 }
   0x7   :  { %144 = vmatpush3.bf16.msra.mxu0 %v155_v1  ;;  %s157_s0 = scalar_lea.vmem %s120_s28, 512  ;;  %p162_p1 = scmp.lt.s32.totalorder %s120_s28, %s120_s28 }
   0x8   :  { %145 = vmatprep.subr.bf16.mxu0 %v156_v4  ;;  %p158_p0 = scmp.ne.s32.totalorder %s120_s28, %s157_s0  ;;  %p163_p2 = scmp.lt.s32.totalorder %s157_s0, %s157_s0 }
   0xa   :  { %p164_p3 = por %p163_p2, %p162_p1 }
   0xb   :  { %146 = vmatpush3.bf16.msra.mxu0 %v156_v4 }
   0xc   :  { %p165_p4 = pnand %p164_p3, %p158_p0 }
   0xe   :  { %148 = vmatmul.mubr.msk.bf16.vlgmr.msra.gmra.mrb[0].mxu0 %vm53_vm0, %v27_v8 }
  0xe1   :  { %v149_v10 = vpop.f32.mrb[0].mxu0 }
  0xe2   :  { %v103_v11 = vadd.f32 %v149_v10, %v130_v9  ;;  %v94_v12 = vpop.f32.mrb[1].mxu0 }
  0xe3   :  { %v95_v13 = vadd.f32 %v130_v9, %v94_v12  ;;  %v150_v14 = vpop.f32.mrb[2].mxu0 }
  0xe4   :  { %112 = vst.msk [vmem:[#allocation2 + $0x10] sm:$0xff] %vm109_vm1, %v103_v11  ;;  %v106_v15 = vadd.f32 %v150_v14, %v130_v9  ;;  %v97_v16 = vpop.f32.mrb[3].mxu0 }
  0xe5   :  { %110 = vst.msk [vmem:[#allocation2] sm:$0xff] %vm109_vm1, %v95_v13  ;;  %v98_v17 = vadd.f32 %v130_v9, %v97_v16 }
  0xe6   :  { %113 = vst.msk [vmem:[#allocation2 + $0x18] sm:$0xff] %vm109_vm1, %v106_v15 }
  0xe7   :  { %111 = vst.msk [vmem:[#allocation2 + $0x8] sm:$0xff] %vm109_vm1, %v98_v17 }
  0xe8   :  { %168 = shalt.err (!%p165_p4)
}
  0xe9   :  { %s169_s30 = scalar_lea.hbm %s243_s3, 512 }
  0xea   :  { %p170_p5 = scmp.ne.s32.totalorder %s243_s3, %s169_s30  ;;  %p173_p6 = scmp.lt.u32.totalorder %s169_s30, %s243_s3 }
  0xec   :  { %p175_p7 = pnand %p173_p6, %p170_p5 }
  0xee   :  { %178 = shalt.err (!%p175_p7)
}
  0xef   :  { %s182_s8 = smov 128   ;;  %s183_s9 = smov 8  }
  0xf0   :  { %125 = dma.vmem_to_hbm [thread:$0]  %s120_s28, 512, %s243_s3, [#allocation3], %s182_s8, %s182_s8, %s183_s9  }
  0xf1   :  { %179 = dma.done.wait [#allocation3], 512  }
  0xf2   :  { %180 = vsyncadd [#allocation3], 4294966784 }
  0xf3   :  { %129 = vsyncpa [#allocation3], 1 }

</bundles_post_ra>
